<compile_context>
chip_gen: v6e
topology: v6e:2x2x1
jax: 0.10.0
libtpu: 0.0.40
codegen_flags: <defaults>
</compile_context>

<pallas_src>
import functools

import jax
import jax.numpy as jnp
from jax.experimental import pallas as pl
from jax.experimental.pallas import tpu as pltpu

LN_EPS = 1e-5
_LANE = 128
_SUBLANE = 8


def _round_up(v, m):
    return (v + m - 1) // m * m


def _ffn_kernel(x_ref, g_ref, b_ref, w1_ref, b1_ref, w2_ref, b2_ref, o_ref,
                xn_ref, acc_ref, *, dim_actual, mask_cols, approx_gelu):
    k = pl.program_id(1)

    # ---- LayerNorm once per row tile (k == 0); cache xn in the MXU dtype ----
    @pl.when(k == 0)
    def _():
        x = x_ref[...].astype(jnp.float32)
        inv_d = jnp.float32(1.0 / dim_actual)
        mu = jnp.sum(x, axis=-1, keepdims=True) * inv_d       # padded cols add 0
        xc = x - mu
        if mask_cols:
            col = jax.lax.broadcasted_iota(jnp.int32, xc.shape, 1)
            xc = jnp.where(col < dim_actual, xc, 0.0)          # exact variance
        var = jnp.sum(xc * xc, axis=-1, keepdims=True) * inv_d
        # Fold gamma into the rsqrt scale; write straight into the scratch so
        # only one (TM, Dp) f32 temporary stays live.
        scale = jax.lax.rsqrt(var + LN_EPS)
        xn = xc * (scale * g_ref[...].astype(jnp.float32)) \
            + b_ref[...].astype(jnp.float32)
        xn_ref[...] = xn.astype(xn_ref.dtype)
        acc_ref[...] = jnp.zeros_like(acc_ref)

    # ---- hidden chunk k: (TM, Dp) @ (Dp, HC) -> GELU -> @ (HC, Dp) ----------
    h = jnp.dot(xn_ref[...], w1_ref[...], preferred_element_type=jnp.float32)
    h = h + b1_ref[...].astype(jnp.float32)
    if approx_gelu:
        # tanh GELU: transcendental goes to the otherwise-idle EUP slot.
        h = 0.5 * h * (1.0 + jnp.tanh(
            jnp.float32(0.7978845608028654)
            * (h + jnp.float32(0.044715) * h * h * h)))
    else:
        # exact erf GELU, matching torch.nn.GELU() default.
        h = 0.5 * h * (1.0 + jax.lax.erf(h * jnp.float32(0.7071067811865476)))
    # Dropout(p=0.0) == identity.
    acc_ref[...] += jnp.dot(h.astype(w2_ref.dtype), w2_ref[...],
                            preferred_element_type=jnp.float32)

    # ---- finalize on the last hidden chunk ----------------------------------
    @pl.when(k == pl.num_programs(1) - 1)
    def _():
        o_ref[...] = (acc_ref[...]
                      + b2_ref[...].astype(jnp.float32)).astype(o_ref.dtype)


def prepare_ffn_params(gamma, beta, w1, b1, w2, b2, *, hidden_chunk=512):
    """Pad parameters once to lane-aligned shapes (hoisted out of the per-call
    path).  Zero padding is exact: padded gamma/beta/bias entries are 0 and
    padded w1 columns / w2 rows are 0, so padded features/hidden units stay 0
    and contribute nothing.  w1: (dim, hidden), w2: (hidden, dim) -- transpose
    of torch nn.Linear.weight."""
    dim, hidden = w1.shape
    assert gamma.shape == (dim,) and beta.shape == (dim,)
    assert b1.shape == (hidden,) and w2.shape == (hidden, dim) and b2.shape == (dim,)

    dim_pad = _round_up(dim, _LANE)
    # Hidden chunk: multiples of 256 (2x256 MXU on v6e/v7x) unless the whole
    # lane-padded hidden dim is smaller; hidden is padded to a multiple of the
    # chunk so every grid step is full width (no ragged / 128-wide tail).
    hc = max(256, (hidden_chunk // 256) * 256)
    hidden_min = _round_up(hidden, _LANE)
    if hidden_min <= hc:
        hc = hidden_min                      # single chunk -> weights resident
    hidden_pad = _round_up(hidden, hc)

    def pad2(a, r, c):
        return a if a.shape == (r, c) else jnp.pad(
            a, ((0, r - a.shape[0]), (0, c - a.shape[1])))

    def pad_row(v, c):
        v = v.reshape(1, -1)
        return v if v.shape[1] == c else jnp.pad(v, ((0, 0), (0, c - v.shape[1])))

    return dict(
        g=pad_row(gamma, dim_pad), b=pad_row(beta, dim_pad),
        w1=pad2(w1, dim_pad, hidden_pad), b1=pad_row(b1, hidden_pad),
        w2=pad2(w2, hidden_pad, dim_pad), b2=pad_row(b2, dim_pad),
        dim=dim, dim_pad=dim_pad, hidden_pad=hidden_pad, hc=hc)


def feedforward_pallas_prepared(x, params, *, row_tile=None, approx_gelu=True):
    """x: (batch, seq, dim); params from prepare_ffn_params."""
    batch, seq, dim = x.shape
    assert dim == params["dim"]
    n = batch * seq
    dim_pad = params["dim_pad"]
    hidden_pad = params["hidden_pad"]
    hc = params["hc"]
    n_chunks = hidden_pad // hc

    # Generation-aware VMEM budget (~80% of physical per-core VMEM).
    try:
        vmem_cap = int(pltpu.get_tpu_info().vmem_capacity_bytes)
    except Exception:
        vmem_cap = 128 * 2 ** 20
    cap = int(vmem_cap * 0.8)

    # Row tile: bigger on big-VMEM chips (amortizes per-grid-step overhead and
    # weight re-reads), sublane-aligned, and capped so the row axis has >= 2
    # steps when possible (keeps both v7x TensorCores busy under "parallel").
    if row_tile is None:
        row_tile = 512 if vmem_cap >= 96 * 2 ** 20 else 256
    row_tile = max(_SUBLANE, (row_tile // _SUBLANE) * _SUBLANE)
    if n > _SUBLANE:
        row_tile = min(row_tile, _round_up(-(-n // 2), _SUBLANE))
    row_tile = min(row_tile, _round_up(n, _SUBLANE))
    n_pad = _round_up(n, row_tile)
    n_rows = n_pad // row_tile

    x2d = x.reshape(n, dim)
    if (n_pad, dim_pad) != (n, dim):
        x2d = jnp.pad(x2d, ((0, n_pad - n), (0, dim_pad - dim)))

    kernel = functools.partial(
        _ffn_kernel, dim_actual=dim, mask_cols=(dim_pad != dim),
        approx_gelu=approx_gelu)

    itm_x = x.dtype.itemsize
    w_dtype = params["w1"].dtype
    itm_w = jnp.dtype(w_dtype).itemsize
    w_bufs = 1 if n_chunks == 1 else 2
    est = (2 * row_tile * dim_pad * itm_x                    # x (double-buffered)
           + 2 * row_tile * dim_pad * itm_x                  # out
           + w_bufs * 2 * dim_pad * hc * itm_w               # w1 + w2 chunks
           + w_bufs * hc * itm_w + 4 * dim_pad * itm_w       # b1 / gamma,beta,b2
           + row_tile * dim_pad * (4 + itm_w)                # acc + xn scratch
           + row_tile * hc * 4)                              # h intermediate
    vmem_limit = int(min(cap, max(16 * 2 ** 20, int(1.5 * est))))

    args = (x2d, params["g"], params["b"], params["w1"], params["b1"],
            params["w2"], params["b2"])

    def build(use_modes):
        def mode(m):
            return m if use_modes else None
        # Constant-index blocks: single VMEM buffer (no pointless double
        # buffering of resident weights); streamed weight chunks: 2-deep.
        resident = mode(pl.Buffered(buffer_count=1))
        w_mode = (mode(pl.Buffered(buffer_count=1)) if n_chunks == 1
                  else mode(pl.Buffered(buffer_count=2)))
        return pl.pallas_call(
            kernel,
            out_shape=jax.ShapeDtypeStruct((n_pad, dim_pad), x.dtype),
            grid_spec=pltpu.PrefetchScalarGridSpec(
                num_scalar_prefetch=0,
                grid=(n_rows, n_chunks),
                in_specs=[
                    pl.BlockSpec((row_tile, dim_pad),
                                 lambda i, k: (i, 0)),                 # x rows
                    pl.BlockSpec((1, dim_pad), lambda i, k: (0, 0),
                                 pipeline_mode=resident),              # gamma
                    pl.BlockSpec((1, dim_pad), lambda i, k: (0, 0),
                                 pipeline_mode=resident),              # beta
                    pl.BlockSpec((dim_pad, hc), lambda i, k: (0, k),
                                 pipeline_mode=w_mode),                # w1 chunk
                    pl.BlockSpec((1, hc), lambda i, k: (0, k),
                                 pipeline_mode=w_mode),                # b1 chunk
                    pl.BlockSpec((hc, dim_pad), lambda i, k: (k, 0),
                                 pipeline_mode=w_mode),                # w2 chunk
                    pl.BlockSpec((1, dim_pad), lambda i, k: (0, 0),
                                 pipeline_mode=resident),              # b2
                ],
                out_specs=pl.BlockSpec((row_tile, dim_pad),
                                       lambda i, k: (i, 0)),
                scratch_shapes=[
                    pltpu.VMEM((row_tile, dim_pad), w_dtype),     # cached xn
                    pltpu.VMEM((row_tile, dim_pad), jnp.float32),  # f32 acc
                ],
            ),
            compiler_params=pltpu.CompilerParams(
                dimension_semantics=("parallel", "arbitrary"),
                vmem_limit_bytes=vmem_limit),
        )

    try:
        out = build(True)(*args)
    except Exception:
        # Fallback if pipeline_mode/Buffered is unavailable in this JAX build.
        out = build(False)(*args)

    return out[:n, :dim].reshape(batch, seq, dim)


def feedforward_pallas(x, gamma, beta, w1, b1, w2, b2, *, row_tile=None,
                       hidden_chunk=512, approx_gelu=True):
    """Convenience wrapper: pads params and runs the kernel.  For repeated
    calls, hoist prepare_ffn_params out and call feedforward_pallas_prepared."""
    params = prepare_ffn_params(gamma, beta, w1, b1, w2, b2,
                                hidden_chunk=hidden_chunk)
    return feedforward_pallas_prepared(x, params, row_tile=row_tile,
                                       approx_gelu=approx_gelu)


def feedforward_ref(x, gamma, beta, w1, b1, w2, b2, *, approx_gelu=False):
    """Plain-JAX reference matching the PyTorch module semantics."""
    xf = x.astype(jnp.float32)
    mu = jnp.mean(xf, axis=-1, keepdims=True)
    var = jnp.mean((xf - mu) ** 2, axis=-1, keepdims=True)
    xn = (xf - mu) * jax.lax.rsqrt(var + LN_EPS) * gamma + beta
    h = xn @ w1 + b1
    if approx_gelu:
        h = 0.5 * h * (1.0 + jnp.tanh(
            0.7978845608028654 * (h + 0.044715 * h ** 3)))
    else:
        h = 0.5 * h * (1.0 + jax.lax.erf(h / jnp.sqrt(2.0)))
    y = h @ w2 + b2
    return y.astype(x.dtype)


if __name__ == "__main__":
    key = jax.random.PRNGKey(0)
    k_x, k_w1, k_b1, k_w2, k_b2 = jax.random.split(key, 5)

    batch, seq, dim, hidden = 2, 8, 32, 64

    x = jax.random.normal(k_x, (batch, seq, dim), dtype=jnp.float32)

    # LayerNorm params (PyTorch init: weight=1, bias=0)
    gamma = jnp.ones((dim,), dtype=jnp.float32)
    beta = jnp.zeros((dim,), dtype=jnp.float32)

    # Linear params, stored as (in, out) == torch weight.T
    w1 = jax.random.normal(k_w1, (dim, hidden), dtype=jnp.float32) * 0.05
    b1 = jax.random.normal(k_b1, (hidden,), dtype=jnp.float32) * 0.05
    w2 = jax.random.normal(k_w2, (hidden, dim), dtype=jnp.float32) * 0.05
    b2 = jax.random.normal(k_b2, (dim,), dtype=jnp.float32) * 0.05

    # Exact-erf GELU path (matches torch.nn.GELU() default).
    y = jax.block_until_ready(
        feedforward_pallas(x, gamma, beta, w1, b1, w2, b2, approx_gelu=False))
    y_ref = feedforward_ref(x, gamma, beta, w1, b1, w2, b2, approx_gelu=False)
    assert y.shape == (batch, seq, dim)
    err = float(jnp.max(jnp.abs(y - y_ref)))
    assert jnp.allclose(y, y_ref, atol=1e-4, rtol=1e-4), err

    # tanh-approx GELU path (performance default: transcendental on the EUP).
    ya = jax.block_until_ready(
        feedforward_pallas(x, gamma, beta, w1, b1, w2, b2, approx_gelu=True))
    ya_ref = feedforward_ref(x, gamma, beta, w1, b1, w2, b2, approx_gelu=True)
    erra = float(jnp.max(jnp.abs(ya - ya_ref)))
    assert jnp.allclose(ya, ya_ref, atol=1e-4, rtol=1e-4), erra

    print("KERNEL_OK")
</pallas_src>

<mosaic_0001>
module attributes {stable_mosaic.version = 11 : i64} {
  func.func @_ffn_kernel(%arg0: i32, %arg1: i32, %arg2: memref<8x128xf32, #tpu.memory_space<vmem>>, %arg3: memref<1x128xf32, #tpu.memory_space<vmem>>, %arg4: memref<1x128xf32, #tpu.memory_space<vmem>>, %arg5: memref<128x128xf32, #tpu.memory_space<vmem>>, %arg6: memref<1x128xf32, #tpu.memory_space<vmem>>, %arg7: memref<128x128xf32, #tpu.memory_space<vmem>>, %arg8: memref<1x128xf32, #tpu.memory_space<vmem>>, %arg9: memref<8x128xf32, #tpu.memory_space<vmem>>, %arg10: memref<8x128xf32, #tpu.memory_space<vmem>>, %arg11: memref<8x128xf32, #tpu.memory_space<vmem>>) attributes {dimension_semantics = [#tpu.dimension_semantics<parallel>, #tpu.dimension_semantics<arbitrary>], iteration_bounds = array<i64: 2, 1>, scalar_prefetch = 0 : i64, scratch_operands = 2 : i64, tpu.core_type = #tpu.core_type<tc>, window_params = [{transform_indices = @transform_0, window_bounds = array<i64: 8, 128>}, {pipeline_mode = #tpu.pipeline_mode<synchronous>, transform_indices = @transform_1, window_bounds = array<i64: 1, 128>}, {pipeline_mode = #tpu.pipeline_mode<synchronous>, transform_indices = @transform_2, window_bounds = array<i64: 1, 128>}, {pipeline_mode = #tpu.pipeline_mode<synchronous>, transform_indices = @transform_3, window_bounds = array<i64: 128, 128>}, {pipeline_mode = #tpu.pipeline_mode<synchronous>, transform_indices = @transform_4, window_bounds = array<i64: 1, 128>}, {pipeline_mode = #tpu.pipeline_mode<synchronous>, transform_indices = @transform_5, window_bounds = array<i64: 128, 128>}, {pipeline_mode = #tpu.pipeline_mode<synchronous>, transform_indices = @transform_6, window_bounds = array<i64: 1, 128>}, {transform_indices = @transform_7, window_bounds = array<i64: 8, 128>}]} {
    %c0_i32 = arith.constant 0 : i32
    %0 = arith.cmpi eq, %arg1, %c0_i32 : i32
    %1 = arith.extui %0 : i1 to i32
    %c0_i32_0 = arith.constant 0 : i32
    %2 = arith.cmpi ne, %1, %c0_i32_0 : i32
    scf.if %2 {
      %c0_18 = arith.constant 0 : index
      %c0_19 = arith.constant 0 : index
      %25 = vector.load %arg2[%c0_18, %c0_19] : memref<8x128xf32, #tpu.memory_space<vmem>>, vector<8x128xf32>
      %cst_20 = arith.constant dense<0.000000e+00> : vector<8xf32>
      %26 = vector.multi_reduction <add>, %25, %cst_20 [1] : vector<8x128xf32> to vector<8xf32>
      %27 = vector.shape_cast %26 : vector<8xf32> to vector<8x1xf32>
      %cst_21 = arith.constant 3.125000e-02 : f32
      %28 = vector.broadcast %cst_21 : f32 to vector<8x1xf32>
      %29 = arith.mulf %27, %28 : vector<8x1xf32>
      %30 = vector.broadcast %29 : vector<8x1xf32> to vector<8x128xf32>
      %31 = arith.subf %25, %30 : vector<8x128xf32>
      %32 = tpu.iota {dimensions = array<i32: 1>} : vector<8x128xi32>
      %c32_i32 = arith.constant 32 : i32
      %33 = vector.broadcast %c32_i32 : i32 to vector<8x128xi32>
      %34 = arith.cmpi slt, %32, %33 : vector<8x128xi32>
      %cst_22 = arith.constant 0.000000e+00 : f32
      %35 = vector.broadcast %cst_22 : f32 to vector<8x128xf32>
      %36 = arith.select %34, %31, %35 : vector<8x128xi1>, vector<8x128xf32>
      %37 = arith.mulf %36, %36 : vector<8x128xf32>
      %cst_23 = arith.constant dense<0.000000e+00> : vector<8xf32>
      %38 = vector.multi_reduction <add>, %37, %cst_23 [1] : vector<8x128xf32> to vector<8xf32>
      %39 = vector.shape_cast %38 : vector<8xf32> to vector<8x1xf32>
      %cst_24 = arith.constant 3.125000e-02 : f32
      %40 = vector.broadcast %cst_24 : f32 to vector<8x1xf32>
      %41 = arith.mulf %39, %40 : vector<8x1xf32>
      %cst_25 = arith.constant 9.99999974E-6 : f32
      %42 = vector.broadcast %cst_25 : f32 to vector<8x1xf32>
      %43 = arith.addf %41, %42 : vector<8x1xf32>
      %44 = math.rsqrt %43 : vector<8x1xf32>
      %c0_26 = arith.constant 0 : index
      %c0_27 = arith.constant 0 : index
      %45 = vector.load %arg3[%c0_26, %c0_27] : memref<1x128xf32, #tpu.memory_space<vmem>>, vector<1x128xf32>
      %46 = vector.broadcast %44 : vector<8x1xf32> to vector<8x128xf32>
      %47 = vector.broadcast %45 : vector<1x128xf32> to vector<8x128xf32>
      %48 = arith.mulf %46, %47 : vector<8x128xf32>
      %49 = arith.mulf %36, %48 : vector<8x128xf32>
      %c0_28 = arith.constant 0 : index
      %c0_29 = arith.constant 0 : index
      %50 = vector.load %arg4[%c0_28, %c0_29] : memref<1x128xf32, #tpu.memory_space<vmem>>, vector<1x128xf32>
      %51 = vector.broadcast %50 : vector<1x128xf32> to vector<8x128xf32>
      %52 = arith.addf %49, %51 : vector<8x128xf32>
      %c0_30 = arith.constant 0 : index
      %c0_31 = arith.constant 0 : index
      %53 = vector.load %arg10[%c0_30, %c0_31] : memref<8x128xf32, #tpu.memory_space<vmem>>, vector<8x128xf32>
      tpu.vector_store %arg10[%c0_30, %c0_31], %52 {strides = array<i32>} : memref<8x128xf32, #tpu.memory_space<vmem>>, vector<8x128xf32>,
      %cst_32 = arith.constant 0.000000e+00 : f32
      %54 = vector.broadcast %cst_32 : f32 to vector<8x128xf32>
      %c0_33 = arith.constant 0 : index
      %c0_34 = arith.constant 0 : index
      %55 = vector.load %arg11[%c0_33, %c0_34] : memref<8x128xf32, #tpu.memory_space<vmem>>, vector<8x128xf32>
      tpu.vector_store %arg11[%c0_33, %c0_34], %54 {strides = array<i32>} : memref<8x128xf32, #tpu.memory_space<vmem>>, vector<8x128xf32>,
    } else {
    }
    %c0 = arith.constant 0 : index
    %c0_1 = arith.constant 0 : index
    %3 = vector.load %arg10[%c0, %c0_1] : memref<8x128xf32, #tpu.memory_space<vmem>>, vector<8x128xf32>
    %c0_2 = arith.constant 0 : index
    %c0_3 = arith.constant 0 : index
    %4 = vector.load %arg5[%c0_2, %c0_3] : memref<128x128xf32, #tpu.memory_space<vmem>>, vector<128x128xf32>
    %cst = arith.constant dense<0.000000e+00> : vector<8x128xf32>
    %5 = tpu.matmul %3, %4, %cst {dimension_numbers = #tpu.dot_dimension_numbers<[1], [0], [0], [1], [0, 0, 1, 1], [], []>} : vector<8x128xf32>, vector<128x128xf32>, vector<8x128xf32> -> vector<8x128xf32>
    %c0_4 = arith.constant 0 : index
    %c0_5 = arith.constant 0 : index
    %6 = vector.load %arg6[%c0_4, %c0_5] : memref<1x128xf32, #tpu.memory_space<vmem>>, vector<1x128xf32>
    %7 = vector.broadcast %6 : vector<1x128xf32> to vector<8x128xf32>
    %8 = arith.addf %5, %7 : vector<8x128xf32>
    %cst_6 = arith.constant 5.000000e-01 : f32
    %9 = vector.broadcast %cst_6 : f32 to vector<8x128xf32>
    %10 = arith.mulf %9, %8 : vector<8x128xf32>
    %cst_7 = arith.constant 0.707106769 : f32
    %11 = vector.broadcast %cst_7 : f32 to vector<8x128xf32>
    %12 = arith.mulf %8, %11 : vector<8x128xf32>
    %13 = math.erf %12 : vector<8x128xf32>
    %cst_8 = arith.constant 1.000000e+00 : f32
    %14 = vector.broadcast %cst_8 : f32 to vector<8x128xf32>
    %15 = arith.addf %14, %13 : vector<8x128xf32>
    %16 = arith.mulf %10, %15 : vector<8x128xf32>
    %c0_9 = arith.constant 0 : index
    %c0_10 = arith.constant 0 : index
    %17 = vector.load %arg11[%c0_9, %c0_10] : memref<8x128xf32, #tpu.memory_space<vmem>>, vector<8x128xf32>
    %c0_11 = arith.constant 0 : index
    %c0_12 = arith.constant 0 : index
    %18 = vector.load %arg7[%c0_11, %c0_12] : memref<128x128xf32, #tpu.memory_space<vmem>>, vector<128x128xf32>
    %cst_13 = arith.constant dense<0.000000e+00> : vector<8x128xf32>
    %19 = tpu.matmul %16, %18, %cst_13 {dimension_numbers = #tpu.dot_dimension_numbers<[1], [0], [0], [1], [0, 0, 1, 1], [], []>} : vector<8x128xf32>, vector<128x128xf32>, vector<8x128xf32> -> vector<8x128xf32>
    %20 = arith.addf %17, %19 : vector<8x128xf32>
    %c0_14 = arith.constant 0 : index
    %c0_15 = arith.constant 0 : index
    %21 = vector.load %arg11[%c0_14, %c0_15] : memref<8x128xf32, #tpu.memory_space<vmem>>, vector<8x128xf32>
    tpu.vector_store %arg11[%c0_14, %c0_15], %20 {strides = array<i32>} : memref<8x128xf32, #tpu.memory_space<vmem>>, vector<8x128xf32>,
    %c0_i32_16 = arith.constant 0 : i32
    %22 = arith.cmpi eq, %arg1, %c0_i32_16 : i32
    %23 = arith.extui %22 : i1 to i32
    %c0_i32_17 = arith.constant 0 : i32
    %24 = arith.cmpi ne, %23, %c0_i32_17 : i32
    scf.if %24 {
      %c0_18 = arith.constant 0 : index
      %c0_19 = arith.constant 0 : index
      %25 = vector.load %arg11[%c0_18, %c0_19] : memref<8x128xf32, #tpu.memory_space<vmem>>, vector<8x128xf32>
      %c0_20 = arith.constant 0 : index
      %c0_21 = arith.constant 0 : index
      %26 = vector.load %arg8[%c0_20, %c0_21] : memref<1x128xf32, #tpu.memory_space<vmem>>, vector<1x128xf32>
      %27 = vector.broadcast %26 : vector<1x128xf32> to vector<8x128xf32>
      %28 = arith.addf %25, %27 : vector<8x128xf32>
      %c0_22 = arith.constant 0 : index
      %c0_23 = arith.constant 0 : index
      %29 = vector.load %arg9[%c0_22, %c0_23] : memref<8x128xf32, #tpu.memory_space<vmem>>, vector<8x128xf32>
      tpu.vector_store %arg9[%c0_22, %c0_23], %28 {strides = array<i32>} : memref<8x128xf32, #tpu.memory_space<vmem>>, vector<8x128xf32>,
    } else {
    }
    return
  }
  func.func @transform_0(%arg0: i32, %arg1: i32) -> (i32, i32) {
    %c0_i32 = arith.constant 0 : i32
    %c0_i32_0 = arith.constant 0 : i32
    return %arg0, %c0_i32 : i32, i32
  }
  func.func @transform_1(%arg0: i32, %arg1: i32) -> (i32, i32) {
    %c0_i32 = arith.constant 0 : i32
    %c0_i32_0 = arith.constant 0 : i32
    %c0_i32_1 = arith.constant 0 : i32
    return %c0_i32, %c0_i32_0 : i32, i32
  }
  func.func @transform_2(%arg0: i32, %arg1: i32) -> (i32, i32) {
    %c0_i32 = arith.constant 0 : i32
    %c0_i32_0 = arith.constant 0 : i32
    %c0_i32_1 = arith.constant 0 : i32
    return %c0_i32, %c0_i32_0 : i32, i32
  }
  func.func @transform_3(%arg0: i32, %arg1: i32) -> (i32, i32) {
    %c0_i32 = arith.constant 0 : i32
    %c0_i32_0 = arith.constant 0 : i32
    return %c0_i32, %arg1 : i32, i32
  }
  func.func @transform_4(%arg0: i32, %arg1: i32) -> (i32, i32) {
    %c0_i32 = arith.constant 0 : i32
    %c0_i32_0 = arith.constant 0 : i32
    return %c0_i32, %arg1 : i32, i32
  }
  func.func @transform_5(%arg0: i32, %arg1: i32) -> (i32, i32) {
    %c0_i32 = arith.constant 0 : i32
    %c0_i32_0 = arith.constant 0 : i32
    return %arg1, %c0_i32 : i32, i32
  }
  func.func @transform_6(%arg0: i32, %arg1: i32) -> (i32, i32) {
    %c0_i32 = arith.constant 0 : i32
    %c0_i32_0 = arith.constant 0 : i32
    %c0_i32_1 = arith.constant 0 : i32
    return %c0_i32, %c0_i32_0 : i32, i32
  }
  func.func @transform_7(%arg0: i32, %arg1: i32) -> (i32, i32) {
    %c0_i32 = arith.constant 0 : i32
    %c0_i32_0 = arith.constant 0 : i32
    return %arg0, %c0_i32 : i32, i32
  }
}

module attributes {stable_mosaic.version = 11 : i64} {
  func.func @_ffn_kernel(%arg0: i32, %arg1: i32, %arg2: memref<8x128xf32, #tpu.memory_space<vmem>>, %arg3: memref<1x128xf32, #tpu.memory_space<vmem>>, %arg4: memref<1x128xf32, #tpu.memory_space<vmem>>, %arg5: memref<128x128xf32, #tpu.memory_space<vmem>>, %arg6: memref<1x128xf32, #tpu.memory_space<vmem>>, %arg7: memref<128x128xf32, #tpu.memory_space<vmem>>, %arg8: memref<1x128xf32, #tpu.memory_space<vmem>>, %arg9: memref<8x128xf32, #tpu.memory_space<vmem>>, %arg10: memref<8x128xf32, #tpu.memory_space<vmem>>, %arg11: memref<8x128xf32, #tpu.memory_space<vmem>>) attributes {dimension_semantics = [#tpu.dimension_semantics<parallel>, #tpu.dimension_semantics<arbitrary>], iteration_bounds = array<i64: 2, 1>, scalar_prefetch = 0 : i64, scratch_operands = 2 : i64, tpu.core_type = #tpu.core_type<tc>, window_params = [{transform_indices = @transform_0, window_bounds = array<i64: 8, 128>}, {pipeline_mode = #tpu.pipeline_mode<synchronous>, transform_indices = @transform_1, window_bounds = array<i64: 1, 128>}, {pipeline_mode = #tpu.pipeline_mode<synchronous>, transform_indices = @transform_2, window_bounds = array<i64: 1, 128>}, {transform_indices = @transform_3, window_bounds = array<i64: 128, 128>}, {transform_indices = @transform_4, window_bounds = array<i64: 1, 128>}, {transform_indices = @transform_5, window_bounds = array<i64: 128, 128>}, {pipeline_mode = #tpu.pipeline_mode<synchronous>, transform_indices = @transform_6, window_bounds = array<i64: 1, 128>}, {transform_indices = @transform_7, window_bounds = array<i64: 8, 128>}]} {
    %c0_i32 = arith.constant 0 : i32
    %0 = arith.cmpi eq, %arg1, %c0_i32 : i32
    %1 = arith.extui %0 : i1 to i32
    %c0_i32_0 = arith.constant 0 : i32
    %2 = arith.cmpi ne, %1, %c0_i32_0 : i32
    scf.if %2 {
      %c0_18 = arith.constant 0 : index
      %c0_19 = arith.constant 0 : index
      %25 = vector.load %arg2[%c0_18, %c0_19] : memref<8x128xf32, #tpu.memory_space<vmem>>, vector<8x128xf32>
      %cst_20 = arith.constant dense<0.000000e+00> : vector<8xf32>
      %26 = vector.multi_reduction <add>, %25, %cst_20 [1] : vector<8x128xf32> to vector<8xf32>
      %27 = vector.shape_cast %26 : vector<8xf32> to vector<8x1xf32>
      %cst_21 = arith.constant 3.125000e-02 : f32
      %28 = vector.broadcast %cst_21 : f32 to vector<8x1xf32>
      %29 = arith.mulf %27, %28 : vector<8x1xf32>
      %30 = vector.broadcast %29 : vector<8x1xf32> to vector<8x128xf32>
      %31 = arith.subf %25, %30 : vector<8x128xf32>
      %32 = tpu.iota {dimensions = array<i32: 1>} : vector<8x128xi32>
      %c32_i32 = arith.constant 32 : i32
      %33 = vector.broadcast %c32_i32 : i32 to vector<8x128xi32>
      %34 = arith.cmpi slt, %32, %33 : vector<8x128xi32>
      %cst_22 = arith.constant 0.000000e+00 : f32
      %35 = vector.broadcast %cst_22 : f32 to vector<8x128xf32>
      %36 = arith.select %34, %31, %35 : vector<8x128xi1>, vector<8x128xf32>
      %37 = arith.mulf %36, %36 : vector<8x128xf32>
      %cst_23 = arith.constant dense<0.000000e+00> : vector<8xf32>
      %38 = vector.multi_reduction <add>, %37, %cst_23 [1] : vector<8x128xf32> to vector<8xf32>
      %39 = vector.shape_cast %38 : vector<8xf32> to vector<8x1xf32>
      %cst_24 = arith.constant 3.125000e-02 : f32
      %40 = vector.broadcast %cst_24 : f32 to vector<8x1xf32>
      %41 = arith.mulf %39, %40 : vector<8x1xf32>
      %cst_25 = arith.constant 9.99999974E-6 : f32
      %42 = vector.broadcast %cst_25 : f32 to vector<8x1xf32>
      %43 = arith.addf %41, %42 : vector<8x1xf32>
      %44 = math.rsqrt %43 : vector<8x1xf32>
      %c0_26 = arith.constant 0 : index
      %c0_27 = arith.constant 0 : index
      %45 = vector.load %arg3[%c0_26, %c0_27] : memref<1x128xf32, #tpu.memory_space<vmem>>, vector<1x128xf32>
      %46 = vector.broadcast %44 : vector<8x1xf32> to vector<8x128xf32>
      %47 = vector.broadcast %45 : vector<1x128xf32> to vector<8x128xf32>
      %48 = arith.mulf %46, %47 : vector<8x128xf32>
      %49 = arith.mulf %36, %48 : vector<8x128xf32>
      %c0_28 = arith.constant 0 : index
      %c0_29 = arith.constant 0 : index
      %50 = vector.load %arg4[%c0_28, %c0_29] : memref<1x128xf32, #tpu.memory_space<vmem>>, vector<1x128xf32>
      %51 = vector.broadcast %50 : vector<1x128xf32> to vector<8x128xf32>
      %52 = arith.addf %49, %51 : vector<8x128xf32>
      %c0_30 = arith.constant 0 : index
      %c0_31 = arith.constant 0 : index
      %53 = vector.load %arg10[%c0_30, %c0_31] : memref<8x128xf32, #tpu.memory_space<vmem>>, vector<8x128xf32>
      tpu.vector_store %arg10[%c0_30, %c0_31], %52 {strides = array<i32>} : memref<8x128xf32, #tpu.memory_space<vmem>>, vector<8x128xf32>,
      %cst_32 = arith.constant 0.000000e+00 : f32
      %54 = vector.broadcast %cst_32 : f32 to vector<8x128xf32>
      %c0_33 = arith.constant 0 : index
      %c0_34 = arith.constant 0 : index
      %55 = vector.load %arg11[%c0_33, %c0_34] : memref<8x128xf32, #tpu.memory_space<vmem>>, vector<8x128xf32>
      tpu.vector_store %arg11[%c0_33, %c0_34], %54 {strides = array<i32>} : memref<8x128xf32, #tpu.memory_space<vmem>>, vector<8x128xf32>,
    } else {
    }
    %c0 = arith.constant 0 : index
    %c0_1 = arith.constant 0 : index
    %3 = vector.load %arg10[%c0, %c0_1] : memref<8x128xf32, #tpu.memory_space<vmem>>, vector<8x128xf32>
    %c0_2 = arith.constant 0 : index
    %c0_3 = arith.constant 0 : index
    %4 = vector.load %arg5[%c0_2, %c0_3] : memref<128x128xf32, #tpu.memory_space<vmem>>, vector<128x128xf32>
    %cst = arith.constant dense<0.000000e+00> : vector<8x128xf32>
    %5 = tpu.matmul %3, %4, %cst {dimension_numbers = #tpu.dot_dimension_numbers<[1], [0], [0], [1], [0, 0, 1, 1], [], []>} : vector<8x128xf32>, vector<128x128xf32>, vector<8x128xf32> -> vector<8x128xf32>
    %c0_4 = arith.constant 0 : index
    %c0_5 = arith.constant 0 : index
    %6 = vector.load %arg6[%c0_4, %c0_5] : memref<1x128xf32, #tpu.memory_space<vmem>>, vector<1x128xf32>
    %7 = vector.broadcast %6 : vector<1x128xf32> to vector<8x128xf32>
    %8 = arith.addf %5, %7 : vector<8x128xf32>
    %cst_6 = arith.constant 5.000000e-01 : f32
    %9 = vector.broadcast %cst_6 : f32 to vector<8x128xf32>
    %10 = arith.mulf %9, %8 : vector<8x128xf32>
    %cst_7 = arith.constant 0.707106769 : f32
    %11 = vector.broadcast %cst_7 : f32 to vector<8x128xf32>
    %12 = arith.mulf %8, %11 : vector<8x128xf32>
    %13 = math.erf %12 : vector<8x128xf32>
    %cst_8 = arith.constant 1.000000e+00 : f32
    %14 = vector.broadcast %cst_8 : f32 to vector<8x128xf32>
    %15 = arith.addf %14, %13 : vector<8x128xf32>
    %16 = arith.mulf %10, %15 : vector<8x128xf32>
    %c0_9 = arith.constant 0 : index
    %c0_10 = arith.constant 0 : index
    %17 = vector.load %arg11[%c0_9, %c0_10] : memref<8x128xf32, #tpu.memory_space<vmem>>, vector<8x128xf32>
    %c0_11 = arith.constant 0 : index
    %c0_12 = arith.constant 0 : index
    %18 = vector.load %arg7[%c0_11, %c0_12] : memref<128x128xf32, #tpu.memory_space<vmem>>, vector<128x128xf32>
    %cst_13 = arith.constant dense<0.000000e+00> : vector<8x128xf32>
    %19 = tpu.matmul %16, %18, %cst_13 {dimension_numbers = #tpu.dot_dimension_numbers<[1], [0], [0], [1], [0, 0, 1, 1], [], []>} : vector<8x128xf32>, vector<128x128xf32>, vector<8x128xf32> -> vector<8x128xf32>
    %20 = arith.addf %17, %19 : vector<8x128xf32>
    %c0_14 = arith.constant 0 : index
    %c0_15 = arith.constant 0 : index
    %21 = vector.load %arg11[%c0_14, %c0_15] : memref<8x128xf32, #tpu.memory_space<vmem>>, vector<8x128xf32>
    tpu.vector_store %arg11[%c0_14, %c0_15], %20 {strides = array<i32>} : memref<8x128xf32, #tpu.memory_space<vmem>>, vector<8x128xf32>,
    %c0_i32_16 = arith.constant 0 : i32
    %22 = arith.cmpi eq, %arg1, %c0_i32_16 : i32
    %23 = arith.extui %22 : i1 to i32
    %c0_i32_17 = arith.constant 0 : i32
    %24 = arith.cmpi ne, %23, %c0_i32_17 : i32
    scf.if %24 {
      %c0_18 = arith.constant 0 : index
      %c0_19 = arith.constant 0 : index
      %25 = vector.load %arg11[%c0_18, %c0_19] : memref<8x128xf32, #tpu.memory_space<vmem>>, vector<8x128xf32>
      %c0_20 = arith.constant 0 : index
      %c0_21 = arith.constant 0 : index
      %26 = vector.load %arg8[%c0_20, %c0_21] : memref<1x128xf32, #tpu.memory_space<vmem>>, vector<1x128xf32>
      %27 = vector.broadcast %26 : vector<1x128xf32> to vector<8x128xf32>
      %28 = arith.addf %25, %27 : vector<8x128xf32>
      %c0_22 = arith.constant 0 : index
      %c0_23 = arith.constant 0 : index
      %29 = vector.load %arg9[%c0_22, %c0_23] : memref<8x128xf32, #tpu.memory_space<vmem>>, vector<8x128xf32>
      tpu.vector_store %arg9[%c0_22, %c0_23], %28 {strides = array<i32>} : memref<8x128xf32, #tpu.memory_space<vmem>>, vector<8x128xf32>,
    } else {
    }
    return
  }
  func.func @transform_0(%arg0: i32, %arg1: i32) -> (i32, i32) {
    %c0_i32 = arith.constant 0 : i32
    %c0_i32_0 = arith.constant 0 : i32
    return %arg0, %c0_i32 : i32, i32
  }
  func.func @transform_1(%arg0: i32, %arg1: i32) -> (i32, i32) {
    %c0_i32 = arith.constant 0 : i32
    %c0_i32_0 = arith.constant 0 : i32
    %c0_i32_1 = arith.constant 0 : i32
    return %c0_i32, %c0_i32_0 : i32, i32
  }
  func.func @transform_2(%arg0: i32, %arg1: i32) -> (i32, i32) {
    %c0_i32 = arith.constant 0 : i32
    %c0_i32_0 = arith.constant 0 : i32
    %c0_i32_1 = arith.constant 0 : i32
    return %c0_i32, %c0_i32_0 : i32, i32
  }
  func.func @transform_3(%arg0: i32, %arg1: i32) -> (i32, i32) {
    %c0_i32 = arith.constant 0 : i32
    %c0_i32_0 = arith.constant 0 : i32
    return %c0_i32, %arg1 : i32, i32
  }
  func.func @transform_4(%arg0: i32, %arg1: i32) -> (i32, i32) {
    %c0_i32 = arith.constant 0 : i32
    %c0_i32_0 = arith.constant 0 : i32
    return %c0_i32, %arg1 : i32, i32
  }
  func.func @transform_5(%arg0: i32, %arg1: i32) -> (i32, i32) {
    %c0_i32 = arith.constant 0 : i32
    %c0_i32_0 = arith.constant 0 : i32
    return %arg1, %c0_i32 : i32, i32
  }
  func.func @transform_6(%arg0: i32, %arg1: i32) -> (i32, i32) {
    %c0_i32 = arith.constant 0 : i32
    %c0_i32_0 = arith.constant 0 : i32
    %c0_i32_1 = arith.constant 0 : i32
    return %c0_i32, %c0_i32_0 : i32, i32
  }
  func.func @transform_7(%arg0: i32, %arg1: i32) -> (i32, i32) {
    %c0_i32 = arith.constant 0 : i32
    %c0_i32_0 = arith.constant 0 : i32
    return %arg0, %c0_i32 : i32, i32
  }
}

</mosaic_0001>

<bundles_post_ra>
// kernel: tpu_custom_call.1
= control target key start
LH: loop header
LB: loop body
LE: loop exit
PB: predicated region body
PF: predicated region fallthrough
CT: control target
= control target key end

     0   :  { %s1392_s0 = inlined_call_operand.hbm [shape: f32[16,128], index: 0, kind: input, shape index: {}]   ;;  %s1393_s1 = inlined_call_operand.vmem [shape: f32[1,128], index: 1, kind: input, shape index: {}]   ;;  %s1394_s2 = inlined_call_operand.vmem [shape: f32[1,128], index: 2, kind: input, shape index: {}]   ;;  %s1395_s3 = inlined_call_operand.hbm [shape: f32[128,128], index: 3, kind: input, shape index: {}]   ;;  %s1396_s4 = inlined_call_operand.vmem [shape: f32[1,128], index: 4, kind: input, shape index: {}]   ;;  %s1397_s5 = inlined_call_operand.hbm [shape: f32[128,128], index: 5, kind: input, shape index: {}]   ;;  %s1398_s6 = inlined_call_operand.vmem [shape: f32[1,128], index: 6, kind: input, shape index: {}]   ;;  %s1399_s7 = inlined_call_operand.hbm [shape: f32[16,128], index: 7, kind: output, shape index: {}]  }
   0x1   :  { %1404 = sst [smem:[#allocation15_spill]] %s1395_s3 }
   0x2   :  { %1405 = sst [smem:[#allocation16_spill]] %s1397_s5 }
   0x3   :  { %12 = vsyncpa [#allocation5], 0 }
   0x4   :  { %14 = vsyncpa [#allocation5 + $0x1], 0 }
   0x5   :  { %15 = vsyncpa [#allocation8], 0 }
   0x6   :  { %16 = vsyncpa [#allocation6], 0 }
   0x7   :  { %18 = vsyncpa [#allocation6 + $0x1], 0  ;;  %s1162_s24 = smov 0   ;;  %s1164_s25 = smov 0  }
   0x8   :  { %s1166_s26 = smov 0   ;;  %s1168_s27 = smov 0  }
   0x9   :  { %s1170_s28 = smov 0   ;;  %s1172_s29 = smov 0  }
   0xa LB: > { %s731_s30 = sadd.s32 4294967295, %s1112_s29   ;;  %s732_s8 = sadd.s32 4294967294, %s1112_s29   ;;  %s1112_s29 = sphi %s1172_s29, %s24_s29   ;;  %s1108_s28 = sphi %s1170_s28, %s1426_s28   ;;  %s1104_s27 = sphi %s1168_s27, %s1425_s27   ;;  %s1100_s26 = sphi %s1166_s26, %s1424_s26   ;;  %s1096_s25 = sphi %s1164_s25, %s1423_s25   ;;  %s1092_s24 = sphi %s1162_s24, %s1422_s24  }
   0xb   : > { %p56_p0 = scmp.ne.s32.totalorder %s1096_s25, %s1092_s24  ;;  %p1196_p1 = scmp.eq.s32.totalorder %s731_s30, 0 }
   0xc   : > { %p1200_p2 = scmp.eq.s32.totalorder %s731_s30, 1  ;;  %p227_p3 = scmp.eq.s32.totalorder %s732_s8, 1 }
   0xd   : > { %s1406_s9 = scalar_select %p1196_p1, 1, 0 }
   0xe   : > { %p1206_p4 = por %p1196_p1, %p56_p0  ;;  %p733_p5 = scmp.ge.s32.totalorder %s1112_s29, 1 }
   0xf   : > { %p1211_p6 = por %p227_p3, %p56_p0  ;;  %p234_p7 = scmp.lt.s32.totalorder %s1112_s29, 3 }
  0x10   : > { %s1408_s11 = scalar_select %p1206_p4, 1, 0 }
  0x11   : > { %s1409_s12 = scalar_select %p1211_p6, 1, 0 }
  0x12   : > { %p1216_p8 = pnand %p733_p5, %p234_p7  ;;  %s1114_s14 = smov [#allocation7]  }
  0x13   : > { %s254_s15 = sshll.u32 %s1114_s14, 4  ;;  %s1115_s17 = smov [#allocation9]   ;;  %s255_s15 = int_to_ptr.vmem [resolvable:$true] %s254_s15 }
  0x14   : > { %p869_p9 = pneg %p1216_p8  ;;  %s276_s18 = sshll.u32 %s1115_s17, 4  ;;  %s277_s18 = int_to_ptr.vmem [resolvable:$true] %s276_s18 }
  0x15   : > { %s959_s19 = scalar_lea.vmem %s255_s15, 2048  ;;  %p967_p5 = scmp.lt.s32.totalorder %s255_s15, %s255_s15 }
  0x16   : > { %p1225_p11 = pnand %p869_p9, %p1196_p1  ;;  %p960_p13 = scmp.ne.s32.totalorder %s255_s15, %s959_s19 }
  0x17   : > { %p968_p7 = scmp.lt.s32.totalorder %s959_s19, %s959_s19 }
  0x18   : > { %p950_p12 = pneg %p1225_p11 }
  0x19   : > { %p969_p10 = por %p968_p7, %p967_p5 }
  0x1a   : > { %p962_p0 = pnand %p960_p13, %p950_p12 }
  0x1c   : > { %p963_p3 = pneg %p962_p0 }
  0x1e   : > { %p970_p9 = pnand %p969_p10, %p963_p3 }
  0x20   : > { %973 = shalt.err (!%p970_p9)
}
  0x21   : > { %s1116_s20 = smov 128   ;;  %s1117_s21 = smov 8  }
  0x22   : > { %s1412_s3 = sld [smem:[#allocation15_spill]]  ;;  %s985_s30 = scalar_lea.vmem %s277_s18, 2048 }
  0x23   : > { %p986_p6 = scmp.ne.s32.totalorder %s277_s18, %s985_s30  ;;  %p993_p1 = scmp.lt.s32.totalorder %s277_s18, %s277_s18 }
  0x24   : > { %p994_p4 = scmp.lt.s32.totalorder %s985_s30, %s985_s30 }
  0x25   : > { %p988_p13 = pnand %p986_p6, %p950_p12 }
  0x26   : > { %p995_p5 = por %p994_p4, %p993_p1 }
  0x27   : > { %p989_p0 = pneg %p988_p13 }
  0x28   : > { %872 = dma.hbm_to_vmem [thread:$0]  (!%p1225_p11), %s1412_s3, 2048, %s255_s15, [#allocation8], %s1116_s20, %s1116_s20, %s1117_s21  }
  0x29   : > { %p996_p10 = pnand %p995_p5, %p989_p0 }
  0x2b   : > { %999 = shalt.err (!%p996_p10)
}
  0x2c   : > { %s1413_s5 = sld [smem:[#allocation16_spill]]  ;;  %s36_s15 = sadd.s32 1, %s1108_s28 }
  0x2d   : > { %s43_s17 = sadd.s32 1, %s1100_s26  ;;  %p38_p1 = scmp.ge.s32.totalorder %s36_s15, 2 }
  0x2e   : > { %p50_p4 = scmp.ne.s32.totalorder %s1100_s26, %s1096_s25  ;;  %p51_p6 = scmp.eq.s32.totalorder %s1112_s29, 0 }
  0x2f   : > { %p886_p12 = scmp.lt.s32.totalorder %s1112_s29, 2  ;;  %s1428_s15 = smov (%p38_p1, %s36_s15), 0 }
  0x30   : > { %1414 = sst [smem:[#allocation14_spill]] %s1428_s15  ;;  %p52_p3 = por %p51_p6, %p50_p4 }
  0x31   : > { %p1257_p7 = por %p1200_p2, %p50_p4  ;;  %s40_s19 = ssub.s32 %s1108_s28, %s1428_s15 }
  0x32   : > { %875 = dma.hbm_to_vmem [thread:$0]  (!%p1225_p11), %s1413_s5, 2048, %s277_s18, [#allocation8], %s1116_s20, %s1116_s20, %s1117_s21  }
  0x33   : > { %s293_s22 = sand.u32 1, %s1100_s26   ;;  %p41_p9 = scmp.eq.s32.totalorder %s40_s19, 0 }
  0x34   : > { %s738_s18 = sshll.u32 %s293_s22, 3  ;;  %s739_s20 = sshll.u32 %s1108_s28, 7 }
  0x35   : > { %s1266_s21 = scalar_select %p41_p9, %s1100_s26, %s43_s17  }
  0x36   : > { %s302_s8 = scalar_lea.hbm %s1392_s0, %s739_s20  ;;  %s297_s14 = scalar_lea.vmem [#allocation4], %s738_s18 }
  0x37   : > { %s304_s3 = sshll.u32 %s297_s14, 4  ;;  %p1273_p11 = pnand %p886_p12, %p52_p3  ;;  %s305_s3 = int_to_ptr.vmem [resolvable:$true] %s304_s3 }
  0x38   : > { %s294_s5 = scalar_lea.sflag [#allocation5], %s293_s22  ;;  %s1013_s19 = scalar_lea.vmem %s305_s3, 128 }
  0x39   : > { %p1002_p2 = pneg %p1273_p11  ;;  %p1014_p13 = scmp.ne.s32.totalorder %s305_s3, %s1013_s19 }
  0x3a   : > { %s1118_s17 = smov [#allocation4]  }
  0x3b   : > { %p1016_p0 = pnand %p1014_p13, %p1002_p2  ;;  %s1018_s15 = sshll.u32 %s1118_s17, 4  ;;  %s1019_s15 = int_to_ptr.vmem [resolvable:$false] %s1018_s15 }
  0x3c   : > { %s1020_s20 = scalar_lea.vmem %s1019_s15, 256  ;;  %p1021_p10 = scmp.lt.s32.totalorder %s305_s3, %s1019_s15 }
  0x3d   : > { %p1017_p5 = pneg %p1016_p0  ;;  %p1022_p1 = scmp.lt.s32.totalorder %s1020_s20, %s1013_s19 }
  0x3f   : > { %p1023_p4 = por %p1022_p1, %p1021_p10 }
  0x41   : > { %p1024_p6 = pnand %p1023_p4, %p1017_p5 }
  0x43   : > { %1027 = shalt.err (!%p1024_p6)
}
  0x44   : > { %879 = dma.hbm_to_vmem [thread:$0]  (!%p1273_p11), %s302_s8, 128, %s305_s3, %s294_s5  }
  0x45   : > { %313 = sbr.rel (%p1216_p8) target bundleno = 809 (0x329), region = 48  ;;  %s1284_s22 = sand.u32 (!%p1216_p8), 1, %s1096_s25  }
  0x46   : > { %s741_s18 = sshll.u32 (!%p1216_p8), %s1284_s22, 3  ;;  %s316_s23 = scalar_lea.sflag (!%p1216_p8), [#allocation5], %s1284_s22 }
  0x47   : > { %s319_s15 = scalar_lea.vmem (!%p1216_p8), [#allocation4], %s741_s18  ;;  %p1417_p12 = scmp.ne.s32.totalorder (!%p1216_p8), %s1408_s11, 0 }
  0x4a   : > { %1079 = dma.done.wait (%p1417_p12), %s316_s23, 128  }
  0x4b   : > { %1081 = vsyncadd (%p1417_p12), %s316_s23, 4294967168  ;;  %p1418_p3 = scmp.ne.s32.totalorder %s1406_s9, 0 }
  0x4d   : > { %1083 = dma.done.wait (%p1418_p3), [#allocation8], 4096  }
  0x4e   : > { %1085 = vsyncadd (%p1418_p3), [#allocation8], 4294963200  ;;  %v369_v0 = vld [vmem:[%s319_s15] sm:$0xff]  ;;  %v1119_v2 = vmov 0.0   ;;  %v417_v4 = vld [vmem:[#allocation7 + $0x68] sm:$0xff]  ;;  %v374_v6 = vlaneseq  ;;  %vm1120_vm1 = vmmov 0  }
  0x4f   : > { %370 = vadd.xlane.f32.xlu0 %v369_v0  ;;  %v419_v1 = vld [vmem:[#allocation7 + $0x78] sm:$0xff]  ;;  %787 = vmatprep.subr.mxu0 %v1119_v2  ;;  %v418_v3 = vld [vmem:[#allocation7 + $0x70] sm:$0xff]  ;;  %v416_v5 = vld [vmem:[#allocation7 + $0x60] sm:$0xff]  ;;  %s750_s10 = sshll.u32 %s1104_s27, 7  ;;  %s360_s19 = scalar_lea.vmem [#allocation10], %s741_s18 }
  0x50   : > { %822 = vmatprep.subr.mxu1 %v1119_v2  ;;  %788 = vmatpush3.msra.mxu0 %v419_v1  ;;  %v375_v7 = vand.u32 127, %v374_v6  ;;  %v415_v13 = vld [vmem:[#allocation7 + $0x58] sm:$0xff]  ;;  %v414_v14 = vld [vmem:[#allocation7 + $0x50] sm:$0xff]  ;;  %v413_v15 = vld [vmem:[#allocation7 + $0x48] sm:$0xff]  ;;  %s618_s17 = sshll.u32 %s360_s19, 4  ;;  %s1350_s15 = scalar_lea.hbm %s1399_s7, %s750_s10  ;;  %s619_s17 = int_to_ptr.vmem [resolvable:$true] %s618_s17 }
  0x51   : > { %789 = vmatprep.subr.mxu0 %v1119_v2  ;;  %v412_v16 = vld [vmem:[#allocation7 + $0x40] sm:$0xff]  ;;  %819 = vmatprep.mubr.msk.f32.mxu0 %vm1120_vm1, %v1119_v2  ;;  %v411_v17 = vld [vmem:[#allocation7 + $0x38] sm:$0xff]  ;;  %v410_v18 = vld [vmem:[#allocation7 + $0x30] sm:$0xff]  ;;  %s605_s3 = scalar_lea.sflag [#allocation6], %s1284_s22  ;;  %s1028_s5 = scalar_lea.vmem %s619_s17, 128 }
  0x52   : > { %790 = vmatpush3.msra.mxu0 %v418_v3  ;;  %vm376_vm0 = vcmp.lt.s32.totalorder %v375_v7, 32  ;;  %854 = vmatprep.mubr.msk.f32.mxu1 %vm1120_vm1, %v1119_v2  ;;  %v409_v19 = vld [vmem:[#allocation7 + $0x28] sm:$0xff]  ;;  %v408_v20 = vld [vmem:[#allocation7 + $0x20] sm:$0xff]  ;;  %v407_v21 = vld [vmem:[#allocation7 + $0x18] sm:$0xff]  ;;  %p1029_p8 = scmp.ne.s32.totalorder %s619_s17, %s1028_s5  ;;  %s1121_s27 = smov [#allocation10]  }
  0x53   : > { %791 = vmatprep.subr.mxu0 %v1119_v2  ;;  %v406_v22 = vld [vmem:[#allocation7 + $0x10] sm:$0xff]  ;;  %v405_v23 = vld [vmem:[#allocation7 + $0x8] sm:$0xff]  ;;  %v404_v24 = vld [vmem:[#allocation7] sm:$0xff]  ;;  %s1032_s9 = sshll.u32 %s1121_s27, 4  ;;  %s1033_s9 = int_to_ptr.vmem [resolvable:$false] %s1032_s9 }
  0x54   : > { %792 = vmatpush3.msra.mxu0 %v417_v4  ;;  %v518_v25 = vld [vmem:[#allocation9 + $0x78] sm:$0xff]  ;;  %v517_v26 = vld [vmem:[#allocation9 + $0x70] sm:$0xff]  ;;  %v516_v27 = vld [vmem:[#allocation9 + $0x68] sm:$0xff]  ;;  %p1030_p9 = pnand %p1029_p8, %p1257_p7  ;;  %s1034_s18 = scalar_lea.vmem %s1033_s9, 256 }
  0x55   : > { %793 = vmatprep.subr.mxu0 %v1119_v2  ;;  %823 = vmatpush3.msra.mxu1 %v518_v25  ;;  %v515_v28 = vld [vmem:[#allocation9 + $0x60] sm:$0xff]  ;;  %v745_v32 = vld [vmem:[%s1393_s1] ss:$0 sm:$0xff]  ;;  %v514_v38 = vld [vmem:[#allocation9 + $0x58] sm:$0xff]  ;;  %p1035_p2 = scmp.lt.s32.totalorder %s619_s17, %s1033_s9  ;;  %p1036_p13 = scmp.lt.s32.totalorder %s1034_s18, %s1028_s5 }
  0x56   : > { %794 = vmatpush3.msra.mxu0 %v416_v5  ;;  %824 = vmatprep.subr.mxu1 %v1119_v2  ;;  %v746_v35 = vld [vmem:[%s1394_s2] ss:$0 sm:$0xff]  ;;  %v512_v40 = vld [vmem:[#allocation9 + $0x48] sm:$0xff]  ;;  %v511_v41 = vld [vmem:[#allocation9 + $0x40] sm:$0xff]  ;;  %p1031_p11 = pneg %p1030_p9 }
  0x57   : > { %795 = vmatprep.subr.mxu0 %v1119_v2  ;;  %825 = vmatpush3.msra.mxu1 %v517_v26  ;;  %v513_v39 = vld [vmem:[#allocation9 + $0x50] sm:$0xff]  ;;  %v510_v42 = vld [vmem:[#allocation9 + $0x38] sm:$0xff]  ;;  %v508_v44 = vld [vmem:[#allocation9 + $0x28] sm:$0xff]  ;;  %p1037_p0 = por %p1036_p13, %p1035_p2 }
  0x58   : > { %796 = vmatpush3.msra.mxu0 %v415_v13  ;;  %826 = vmatprep.subr.mxu1 %v1119_v2  ;;  %v509_v43 = vld [vmem:[#allocation9 + $0x30] sm:$0xff]  ;;  %v507_v45 = vld [vmem:[#allocation9 + $0x20] sm:$0xff]  ;;  %v506_v46 = vld [vmem:[#allocation9 + $0x18] sm:$0xff] }
  0x59   : > { %797 = vmatprep.subr.mxu0 %v1119_v2  ;;  %827 = vmatpush3.msra.mxu1 %v516_v27  ;;  %v505_v47 = vld [vmem:[#allocation9 + $0x10] sm:$0xff]  ;;  %v504_v48 = vld [vmem:[#allocation9 + $0x8] sm:$0xff]  ;;  %v503_v49 = vld [vmem:[#allocation9] sm:$0xff]  ;;  %p1038_p5 = pnand %p1037_p0, %p1031_p11 }
  0x5a   : > { %798 = vmatpush3.msra.mxu0 %v414_v14  ;;  %828 = vmatprep.subr.mxu1 %v1119_v2  ;;  %v747_v50 = vld [vmem:[%s1396_s4] ss:$0 sm:$0xff] }
  0x5b   : > { %799 = vmatprep.subr.mxu0 %v1119_v2  ;;  %829 = vmatpush3.msra.mxu1 %v515_v28  ;;  %v748_v59 = vld [vmem:[%s1398_s6] ss:$0 sm:$0xff] }
  0x5c   : > { %800 = vmatpush3.msra.mxu0 %v413_v15  ;;  %830 = vmatprep.subr.mxu1 %v1119_v2 }
  0x5d   : > { %801 = vmatprep.subr.mxu0 %v1119_v2  ;;  %831 = vmatpush3.msra.mxu1 %v514_v38 }
  0x5e   : > { %802 = vmatpush3.msra.mxu0 %v412_v16  ;;  %832 = vmatprep.subr.mxu1 %v1119_v2 }
  0x5f   : > { %803 = vmatprep.subr.mxu0 %v1119_v2  ;;  %833 = vmatpush3.msra.mxu1 %v513_v39 }
  0x60   : > { %804 = vmatpush3.msra.mxu0 %v411_v17  ;;  %834 = vmatprep.subr.mxu1 %v1119_v2 }
  0x61   : > { %805 = vmatprep.subr.mxu0 %v1119_v2  ;;  %835 = vmatpush3.msra.mxu1 %v512_v40 }
  0x62   : > { %806 = vmatpush3.msra.mxu0 %v410_v18  ;;  %836 = vmatprep.subr.mxu1 %v1119_v2 }
  0x63   : > { %807 = vmatprep.subr.mxu0 %v1119_v2  ;;  %837 = vmatpush3.msra.mxu1 %v511_v41 }
  0x64   : > { %808 = vmatpush3.msra.mxu0 %v409_v19  ;;  %838 = vmatprep.subr.mxu1 %v1119_v2 }
  0x65   : > { %809 = vmatprep.subr.mxu0 %v1119_v2  ;;  %839 = vmatpush3.msra.mxu1 %v510_v42 }
  0x66   : > { %810 = vmatpush3.msra.mxu0 %v408_v20  ;;  %840 = vmatprep.subr.mxu1 %v1119_v2 }
  0x67   : > { %811 = vmatprep.subr.mxu0 %v1119_v2  ;;  %841 = vmatpush3.msra.mxu1 %v509_v43 }
  0x68   : > { %812 = vmatpush3.msra.mxu0 %v407_v21  ;;  %842 = vmatprep.subr.mxu1 %v1119_v2 }
  0x69   : > { %813 = vmatprep.subr.mxu0 %v1119_v2  ;;  %843 = vmatpush3.msra.mxu1 %v508_v44 }
  0x6a   : > { %814 = vmatpush3.msra.mxu0 %v406_v22  ;;  %844 = vmatprep.subr.mxu1 %v1119_v2 }
  0x6b   : > { %815 = vmatprep.subr.mxu0 %v1119_v2  ;;  %845 = vmatpush3.msra.mxu1 %v507_v45 }
  0x6c   : > { %816 = vmatpush3.msra.mxu0 %v405_v23  ;;  %846 = vmatprep.subr.mxu1 %v1119_v2 }
  0x6d   : > { %817 = vmatprep.subr.mxu0 %v1119_v2  ;;  %847 = vmatpush3.msra.mxu1 %v506_v46 }
  0x6e   : > { %818 = vmatpush3.msra.mxu0 %v404_v24  ;;  %848 = vmatprep.subr.mxu1 %v1119_v2 }
  0x6f   : > { %849 = vmatpush3.msra.mxu1 %v505_v47 }
  0x70   : > { %850 = vmatprep.subr.mxu1 %v1119_v2 }
  0x71   : > { %851 = vmatpush3.msra.mxu1 %v504_v48 }
  0x72   : > { %852 = vmatprep.subr.mxu1 %v1119_v2 }
  0x73   : > { %853 = vmatpush3.msra.mxu1 %v503_v49 }
  0xd8   : > { %v371_v8 = vpop.xlane.xlu0 %370 }
  0xd9   : > { %v372_v9 = vmul.f32 0.03125, %v371_v8 }
  0xdb   : > { %v373_v10 = vsub.f32 %v369_v0, %v372_v9 }
  0xdd   : > { %v377_v11 = vsel %vm376_vm0, %v373_v10, 0.0 }
  0xde   : > { %v378_v12 = vmul.f32 %v377_v11, %v377_v11 }
  0xe0   : > { %379 = vadd.xlane.f32.xlu0 %v378_v12 }
 0x169   : > { %v380_v29 = vpop.xlane.xlu0 %379 }
 0x16a   : > { %v381_v30 = vmul.f32 0.03125, %v380_v29 }
 0x16c   : > { %v382_v31 = vadd.f32 1e-05, %v381_v30 }
 0x16e   : > { %944 = vrsqrt.f32 %v382_v31 }
 0x17b   : > { %v945_v33 = vpop.eup %944 }
 0x17c   : > { %v391_v34 = vmul.f32 %v945_v33, %v745_v32 }
 0x17e   : > { %v392_v36 = vmul.f32 %v391_v34, %v377_v11 }
 0x180   : > { %v400_v37 = vadd.f32 %v746_v35, %v392_v36 }
 0x182   : > { %820 = vmatmul.mubr.f32.vlgmr.msra.gmra.mxu0 %v400_v37 }
 0x242   : > { %v493_v51 = vpop.f32.mrf.mxu0 }
 0x243   : > { %v494_v52 = vadd.f32 %v747_v50, %v493_v51 }
 0x244   : > { %v821_v53 = vpop.f32.mrf.mxu0 }
 0x245   : > { %v498_v54 = vmul.f32 0.70710677, %v494_v52  ;;  %v497_v56 = vmul.f32 0.5, %v494_v52 }
 0x247   : > { %946 = verf.f32 %v498_v54 }
 0x254   : > { %v947_v55 = vpop.eup %946 }
 0x255   : > { %v500_v57 = vadd.f32 1.0, %v947_v55 }
 0x257   : > { %v501_v58 = vmul.f32 %v500_v57, %v497_v56 }
 0x259   : > { %855 = vmatmul.mubr.f32.vlgmr.msra.gmra.mxu1 %v501_v58 }
 0x319   : > { %v585_v60 = vpop.f32.mrf.mxu1 }
 0x31a   : > { %v602_v61 = vadd.f32 %v748_v59, %v585_v60 }
 0x31b   : > { %v856_v62 = vpop.f32.mrf.mxu1 }
 0x31c   : > { %603 = vst [vmem:[%s360_s19] sm:$0xff] %v602_v61 }
 0x31d   : > { %1041 = shalt.err (!%p1038_p5)
}
 0x31e   : > { %s1042_s11 = scalar_lea.hbm %s1350_s15, 128  ;;  %s1046_s30 = scalar_lea.hbm %s1399_s7, 256 }
 0x31f   : > { %p1043_p10 = scmp.ne.s32.totalorder %s1350_s15, %s1042_s11  ;;  %p1047_p6 = scmp.lt.s32.totalorder %s1350_s15, %s1399_s7 }
 0x320   : > { %p1048_p12 = scmp.lt.s32.totalorder %s1046_s30, %s1042_s11 }
 0x321   : > { %p1044_p1 = pnand %p1043_p10, %p1257_p7 }
 0x322   : > { %p1049_p3 = por %p1048_p12, %p1047_p6 }
 0x323   : > { %p1045_p4 = pneg %p1044_p1 }
 0x325   : > { %p1050_p8 = pnand %p1049_p3, %p1045_p4 }
 0x327   : > { %1053 = shalt.err (!%p1050_p8)
}
 0x328   : > { %867 = dma.vmem_to_hbm [thread:$0]  (%p1257_p7), %s619_s17, 128, %s1350_s15, %s605_s3  }
 0x329 PF: > { %s630_s10 = sand.u32 1, %s1092_s24   ;;  %p1419_p9 = scmp.ne.s32.totalorder %s1409_s12, 0 }
 0x32a   : > { %p1420_p11 = scmp.ge.s32.totalorder %s1112_s29, 2  ;;  %s631_s19 = scalar_lea.sflag [#allocation6], %s630_s10 }
 0x32c   : > { %p881_p2 = pnand %p1420_p11, %p1419_p9 }
 0x32e   : > { %p882_p13 = pneg %p881_p2 }
 0x330   : > { %1087 = dma.done.wait (%p882_p13), %s631_s19, 128  }
 0x331   : > { %1089 = vsyncadd (%p882_p13), %s631_s19, 4294967168  ;;  %s24_s29 = sadd.s32 1, %s1112_s29   ;;  %s1421_s16 = sld [smem:[#allocation14_spill]] }
 0x332   : > { %p21_p0 = scmp.ge.s32.totalorder %s24_s29, 4   ;;  %s1422_s24 = smov %s1096_s25 }
 0x333   : > { %s1423_s25 = smov %s1100_s26  ;;  %s1424_s26 = smov %s1266_s21 }
 0x334   : > { %s1425_s27 = smov %s1108_s28  ;;  %23 = sbr.rel (!%p21_p0) target bundleno = 10 (0xa), region = 114 }
 0x337   : > { %s1426_s28 = smov %s1421_s16 }
 0x339   :  { %636 = vsyncpa [#allocation5], 1 }
 0x33a   :  { %638 = vsyncpa [#allocation5 + $0x1], 1 }
 0x33b   :  { %639 = vsyncpa [#allocation8], 1 }
 0x33c   :  { %640 = vsyncpa [#allocation6], 1 }
 0x33d   :  { %642 = vsyncpa [#allocation6 + $0x1], 1 }

// kernel: tpu_custom_call.1
= control target key start
LH: loop header
LB: loop body
LE: loop exit
PB: predicated region body
PF: predicated region fallthrough
CT: control target
= control target key end

     0   :  { %s1392_s0 = inlined_call_operand.hbm [shape: f32[16,128], index: 0, kind: input, shape index: {}]   ;;  %s1393_s1 = inlined_call_operand.vmem [shape: f32[1,128], index: 1, kind: input, shape index: {}]   ;;  %s1394_s2 = inlined_call_operand.vmem [shape: f32[1,128], index: 2, kind: input, shape index: {}]   ;;  %s1395_s3 = inlined_call_operand.hbm [shape: f32[128,128], index: 3, kind: input, shape index: {}]   ;;  %s1396_s4 = inlined_call_operand.vmem [shape: f32[1,128], index: 4, kind: input, shape index: {}]   ;;  %s1397_s5 = inlined_call_operand.hbm [shape: f32[128,128], index: 5, kind: input, shape index: {}]   ;;  %s1398_s6 = inlined_call_operand.vmem [shape: f32[1,128], index: 6, kind: input, shape index: {}]   ;;  %s1399_s7 = inlined_call_operand.hbm [shape: f32[16,128], index: 7, kind: output, shape index: {}]  }
   0x1   :  { %1404 = sst [smem:[#allocation15_spill]] %s1395_s3 }
   0x2   :  { %1405 = sst [smem:[#allocation16_spill]] %s1397_s5 }
   0x3   :  { %12 = vsyncpa [#allocation5], 0 }
   0x4   :  { %14 = vsyncpa [#allocation5 + $0x1], 0 }
   0x5   :  { %15 = vsyncpa [#allocation8], 0 }
   0x6   :  { %16 = vsyncpa [#allocation6], 0 }
   0x7   :  { %18 = vsyncpa [#allocation6 + $0x1], 0  ;;  %s1162_s24 = smov 0   ;;  %s1164_s25 = smov 0  }
   0x8   :  { %s1166_s26 = smov 0   ;;  %s1168_s27 = smov 0  }
   0x9   :  { %s1170_s28 = smov 0   ;;  %s1172_s29 = smov 0  }
   0xa LB: > { %s731_s30 = sadd.s32 4294967295, %s1112_s29   ;;  %s732_s8 = sadd.s32 4294967294, %s1112_s29   ;;  %s1112_s29 = sphi %s1172_s29, %s24_s29   ;;  %s1108_s28 = sphi %s1170_s28, %s1426_s28   ;;  %s1104_s27 = sphi %s1168_s27, %s1425_s27   ;;  %s1100_s26 = sphi %s1166_s26, %s1424_s26   ;;  %s1096_s25 = sphi %s1164_s25, %s1423_s25   ;;  %s1092_s24 = sphi %s1162_s24, %s1422_s24  }
   0xb   : > { %p56_p0 = scmp.ne.s32.totalorder %s1096_s25, %s1092_s24  ;;  %p1196_p1 = scmp.eq.s32.totalorder %s731_s30, 0 }
   0xc   : > { %p1200_p2 = scmp.eq.s32.totalorder %s731_s30, 1  ;;  %p227_p3 = scmp.eq.s32.totalorder %s732_s8, 1 }
   0xd   : > { %s1406_s9 = scalar_select %p1196_p1, 1, 0 }
   0xe   : > { %p1206_p4 = por %p1196_p1, %p56_p0  ;;  %p733_p5 = scmp.ge.s32.totalorder %s1112_s29, 1 }
   0xf   : > { %p1211_p6 = por %p227_p3, %p56_p0  ;;  %p234_p7 = scmp.lt.s32.totalorder %s1112_s29, 3 }
  0x10   : > { %s1408_s11 = scalar_select %p1206_p4, 1, 0 }
  0x11   : > { %s1409_s12 = scalar_select %p1211_p6, 1, 0 }
  0x12   : > { %p1216_p8 = pnand %p733_p5, %p234_p7  ;;  %s1114_s14 = smov [#allocation7]  }
  0x13   : > { %s254_s15 = sshll.u32 %s1114_s14, 4  ;;  %s1115_s17 = smov [#allocation9]   ;;  %s255_s15 = int_to_ptr.vmem [resolvable:$true] %s254_s15 }
  0x14   : > { %p869_p9 = pneg %p1216_p8  ;;  %s276_s18 = sshll.u32 %s1115_s17, 4  ;;  %s277_s18 = int_to_ptr.vmem [resolvable:$true] %s276_s18 }
  0x15   : > { %s959_s19 = scalar_lea.vmem %s255_s15, 2048  ;;  %p967_p5 = scmp.lt.s32.totalorder %s255_s15, %s255_s15 }
  0x16   : > { %p1225_p11 = pnand %p869_p9, %p1196_p1  ;;  %p960_p13 = scmp.ne.s32.totalorder %s255_s15, %s959_s19 }
  0x17   : > { %p968_p7 = scmp.lt.s32.totalorder %s959_s19, %s959_s19 }
  0x18   : > { %p950_p12 = pneg %p1225_p11 }
  0x19   : > { %p969_p10 = por %p968_p7, %p967_p5 }
  0x1a   : > { %p962_p0 = pnand %p960_p13, %p950_p12 }
  0x1c   : > { %p963_p3 = pneg %p962_p0 }
  0x1e   : > { %p970_p9 = pnand %p969_p10, %p963_p3 }
  0x20   : > { %973 = shalt.err (!%p970_p9)
}
  0x21   : > { %s1116_s20 = smov 128   ;;  %s1117_s21 = smov 8  }
  0x22   : > { %s1412_s3 = sld [smem:[#allocation15_spill]]  ;;  %s985_s30 = scalar_lea.vmem %s277_s18, 2048 }
  0x23   : > { %p986_p6 = scmp.ne.s32.totalorder %s277_s18, %s985_s30  ;;  %p993_p1 = scmp.lt.s32.totalorder %s277_s18, %s277_s18 }
  0x24   : > { %p994_p4 = scmp.lt.s32.totalorder %s985_s30, %s985_s30 }
  0x25   : > { %p988_p13 = pnand %p986_p6, %p950_p12 }
  0x26   : > { %p995_p5 = por %p994_p4, %p993_p1 }
  0x27   : > { %p989_p0 = pneg %p988_p13 }
  0x28   : > { %872 = dma.hbm_to_vmem [thread:$0]  (!%p1225_p11), %s1412_s3, 2048, %s255_s15, [#allocation8], %s1116_s20, %s1116_s20, %s1117_s21  }
  0x29   : > { %p996_p10 = pnand %p995_p5, %p989_p0 }
  0x2b   : > { %999 = shalt.err (!%p996_p10)
}
  0x2c   : > { %s1413_s5 = sld [smem:[#allocation16_spill]]  ;;  %s36_s15 = sadd.s32 1, %s1108_s28 }
  0x2d   : > { %s43_s17 = sadd.s32 1, %s1100_s26  ;;  %p38_p1 = scmp.ge.s32.totalorder %s36_s15, 2 }
  0x2e   : > { %p50_p4 = scmp.ne.s32.totalorder %s1100_s26, %s1096_s25  ;;  %p51_p6 = scmp.eq.s32.totalorder %s1112_s29, 0 }
  0x2f   : > { %p886_p12 = scmp.lt.s32.totalorder %s1112_s29, 2  ;;  %s1428_s15 = smov (%p38_p1, %s36_s15), 0 }
  0x30   : > { %1414 = sst [smem:[#allocation14_spill]] %s1428_s15  ;;  %p52_p3 = por %p51_p6, %p50_p4 }
  0x31   : > { %p1257_p7 = por %p1200_p2, %p50_p4  ;;  %s40_s19 = ssub.s32 %s1108_s28, %s1428_s15 }
  0x32   : > { %875 = dma.hbm_to_vmem [thread:$0]  (!%p1225_p11), %s1413_s5, 2048, %s277_s18, [#allocation8], %s1116_s20, %s1116_s20, %s1117_s21  }
  0x33   : > { %s293_s22 = sand.u32 1, %s1100_s26   ;;  %p41_p9 = scmp.eq.s32.totalorder %s40_s19, 0 }
  0x34   : > { %s738_s18 = sshll.u32 %s293_s22, 3  ;;  %s739_s20 = sshll.u32 %s1108_s28, 7 }
  0x35   : > { %s1266_s21 = scalar_select %p41_p9, %s1100_s26, %s43_s17  }
  0x36   : > { %s302_s8 = scalar_lea.hbm %s1392_s0, %s739_s20  ;;  %s297_s14 = scalar_lea.vmem [#allocation4], %s738_s18 }
  0x37   : > { %s304_s3 = sshll.u32 %s297_s14, 4  ;;  %p1273_p11 = pnand %p886_p12, %p52_p3  ;;  %s305_s3 = int_to_ptr.vmem [resolvable:$true] %s304_s3 }
  0x38   : > { %s294_s5 = scalar_lea.sflag [#allocation5], %s293_s22  ;;  %s1013_s19 = scalar_lea.vmem %s305_s3, 128 }
  0x39   : > { %p1002_p2 = pneg %p1273_p11  ;;  %p1014_p13 = scmp.ne.s32.totalorder %s305_s3, %s1013_s19 }
  0x3a   : > { %s1118_s17 = smov [#allocation4]  }
  0x3b   : > { %p1016_p0 = pnand %p1014_p13, %p1002_p2  ;;  %s1018_s15 = sshll.u32 %s1118_s17, 4  ;;  %s1019_s15 = int_to_ptr.vmem [resolvable:$false] %s1018_s15 }
  0x3c   : > { %s1020_s20 = scalar_lea.vmem %s1019_s15, 256  ;;  %p1021_p10 = scmp.lt.s32.totalorder %s305_s3, %s1019_s15 }
  0x3d   : > { %p1017_p5 = pneg %p1016_p0  ;;  %p1022_p1 = scmp.lt.s32.totalorder %s1020_s20, %s1013_s19 }
  0x3f   : > { %p1023_p4 = por %p1022_p1, %p1021_p10 }
  0x41   : > { %p1024_p6 = pnand %p1023_p4, %p1017_p5 }
  0x43   : > { %1027 = shalt.err (!%p1024_p6)
}
  0x44   : > { %879 = dma.hbm_to_vmem [thread:$0]  (!%p1273_p11), %s302_s8, 128, %s305_s3, %s294_s5  }
  0x45   : > { %313 = sbr.rel (%p1216_p8) target bundleno = 809 (0x329), region = 48  ;;  %s1284_s22 = sand.u32 (!%p1216_p8), 1, %s1096_s25  }
  0x46   : > { %s741_s18 = sshll.u32 (!%p1216_p8), %s1284_s22, 3  ;;  %s316_s23 = scalar_lea.sflag (!%p1216_p8), [#allocation5], %s1284_s22 }
  0x47   : > { %s319_s15 = scalar_lea.vmem (!%p1216_p8), [#allocation4], %s741_s18  ;;  %p1417_p12 = scmp.ne.s32.totalorder (!%p1216_p8), %s1408_s11, 0 }
  0x4a   : > { %1079 = dma.done.wait (%p1417_p12), %s316_s23, 128  }
  0x4b   : > { %1081 = vsyncadd (%p1417_p12), %s316_s23, 4294967168  ;;  %p1418_p3 = scmp.ne.s32.totalorder %s1406_s9, 0 }
  0x4d   : > { %1083 = dma.done.wait (%p1418_p3), [#allocation8], 4096  }
  0x4e   : > { %1085 = vsyncadd (%p1418_p3), [#allocation8], 4294963200  ;;  %v369_v0 = vld [vmem:[%s319_s15] sm:$0xff]  ;;  %v1119_v2 = vmov 0.0   ;;  %v417_v4 = vld [vmem:[#allocation7 + $0x68] sm:$0xff]  ;;  %v374_v6 = vlaneseq  ;;  %vm1120_vm1 = vmmov 0  }
  0x4f   : > { %370 = vadd.xlane.f32.xlu0 %v369_v0  ;;  %v419_v1 = vld [vmem:[#allocation7 + $0x78] sm:$0xff]  ;;  %787 = vmatprep.subr.mxu0 %v1119_v2  ;;  %v418_v3 = vld [vmem:[#allocation7 + $0x70] sm:$0xff]  ;;  %v416_v5 = vld [vmem:[#allocation7 + $0x60] sm:$0xff]  ;;  %s750_s10 = sshll.u32 %s1104_s27, 7  ;;  %s360_s19 = scalar_lea.vmem [#allocation10], %s741_s18 }
  0x50   : > { %822 = vmatprep.subr.mxu1 %v1119_v2  ;;  %788 = vmatpush3.msra.mxu0 %v419_v1  ;;  %v375_v7 = vand.u32 127, %v374_v6  ;;  %v415_v13 = vld [vmem:[#allocation7 + $0x58] sm:$0xff]  ;;  %v414_v14 = vld [vmem:[#allocation7 + $0x50] sm:$0xff]  ;;  %v413_v15 = vld [vmem:[#allocation7 + $0x48] sm:$0xff]  ;;  %s618_s17 = sshll.u32 %s360_s19, 4  ;;  %s1350_s15 = scalar_lea.hbm %s1399_s7, %s750_s10  ;;  %s619_s17 = int_to_ptr.vmem [resolvable:$true] %s618_s17 }
  0x51   : > { %789 = vmatprep.subr.mxu0 %v1119_v2  ;;  %v412_v16 = vld [vmem:[#allocation7 + $0x40] sm:$0xff]  ;;  %819 = vmatprep.mubr.msk.f32.mxu0 %vm1120_vm1, %v1119_v2  ;;  %v411_v17 = vld [vmem:[#allocation7 + $0x38] sm:$0xff]  ;;  %v410_v18 = vld [vmem:[#allocation7 + $0x30] sm:$0xff]  ;;  %s605_s3 = scalar_lea.sflag [#allocation6], %s1284_s22  ;;  %s1028_s5 = scalar_lea.vmem %s619_s17, 128 }
  0x52   : > { %790 = vmatpush3.msra.mxu0 %v418_v3  ;;  %vm376_vm0 = vcmp.lt.s32.totalorder %v375_v7, 32  ;;  %854 = vmatprep.mubr.msk.f32.mxu1 %vm1120_vm1, %v1119_v2  ;;  %v409_v19 = vld [vmem:[#allocation7 + $0x28] sm:$0xff]  ;;  %v408_v20 = vld [vmem:[#allocation7 + $0x20] sm:$0xff]  ;;  %v407_v21 = vld [vmem:[#allocation7 + $0x18] sm:$0xff]  ;;  %p1029_p8 = scmp.ne.s32.totalorder %s619_s17, %s1028_s5  ;;  %s1121_s27 = smov [#allocation10]  }
  0x53   : > { %791 = vmatprep.subr.mxu0 %v1119_v2  ;;  %v406_v22 = vld [vmem:[#allocation7 + $0x10] sm:$0xff]  ;;  %v405_v23 = vld [vmem:[#allocation7 + $0x8] sm:$0xff]  ;;  %v404_v24 = vld [vmem:[#allocation7] sm:$0xff]  ;;  %s1032_s9 = sshll.u32 %s1121_s27, 4  ;;  %s1033_s9 = int_to_ptr.vmem [resolvable:$false] %s1032_s9 }
  0x54   : > { %792 = vmatpush3.msra.mxu0 %v417_v4  ;;  %v518_v25 = vld [vmem:[#allocation9 + $0x78] sm:$0xff]  ;;  %v517_v26 = vld [vmem:[#allocation9 + $0x70] sm:$0xff]  ;;  %v516_v27 = vld [vmem:[#allocation9 + $0x68] sm:$0xff]  ;;  %p1030_p9 = pnand %p1029_p8, %p1257_p7  ;;  %s1034_s18 = scalar_lea.vmem %s1033_s9, 256 }
  0x55   : > { %793 = vmatprep.subr.mxu0 %v1119_v2  ;;  %823 = vmatpush3.msra.mxu1 %v518_v25  ;;  %v515_v28 = vld [vmem:[#allocation9 + $0x60] sm:$0xff]  ;;  %v745_v32 = vld [vmem:[%s1393_s1] ss:$0 sm:$0xff]  ;;  %v514_v38 = vld [vmem:[#allocation9 + $0x58] sm:$0xff]  ;;  %p1035_p2 = scmp.lt.s32.totalorder %s619_s17, %s1033_s9  ;;  %p1036_p13 = scmp.lt.s32.totalorder %s1034_s18, %s1028_s5 }
  0x56   : > { %794 = vmatpush3.msra.mxu0 %v416_v5  ;;  %824 = vmatprep.subr.mxu1 %v1119_v2  ;;  %v746_v35 = vld [vmem:[%s1394_s2] ss:$0 sm:$0xff]  ;;  %v512_v40 = vld [vmem:[#allocation9 + $0x48] sm:$0xff]  ;;  %v511_v41 = vld [vmem:[#allocation9 + $0x40] sm:$0xff]  ;;  %p1031_p11 = pneg %p1030_p9 }
  0x57   : > { %795 = vmatprep.subr.mxu0 %v1119_v2  ;;  %825 = vmatpush3.msra.mxu1 %v517_v26  ;;  %v513_v39 = vld [vmem:[#allocation9 + $0x50] sm:$0xff]  ;;  %v510_v42 = vld [vmem:[#allocation9 + $0x38] sm:$0xff]  ;;  %v508_v44 = vld [vmem:[#allocation9 + $0x28] sm:$0xff]  ;;  %p1037_p0 = por %p1036_p13, %p1035_p2 }
  0x58   : > { %796 = vmatpush3.msra.mxu0 %v415_v13  ;;  %826 = vmatprep.subr.mxu1 %v1119_v2  ;;  %v509_v43 = vld [vmem:[#allocation9 + $0x30] sm:$0xff]  ;;  %v507_v45 = vld [vmem:[#allocation9 + $0x20] sm:$0xff]  ;;  %v506_v46 = vld [vmem:[#allocation9 + $0x18] sm:$0xff] }
  0x59   : > { %797 = vmatprep.subr.mxu0 %v1119_v2  ;;  %827 = vmatpush3.msra.mxu1 %v516_v27  ;;  %v505_v47 = vld [vmem:[#allocation9 + $0x10] sm:$0xff]  ;;  %v504_v48 = vld [vmem:[#allocation9 + $0x8] sm:$0xff]  ;;  %v503_v49 = vld [vmem:[#allocation9] sm:$0xff]  ;;  %p1038_p5 = pnand %p1037_p0, %p1031_p11 }
  0x5a   : > { %798 = vmatpush3.msra.mxu0 %v414_v14  ;;  %828 = vmatprep.subr.mxu1 %v1119_v2  ;;  %v747_v50 = vld [vmem:[%s1396_s4] ss:$0 sm:$0xff] }
  0x5b   : > { %799 = vmatprep.subr.mxu0 %v1119_v2  ;;  %829 = vmatpush3.msra.mxu1 %v515_v28  ;;  %v748_v59 = vld [vmem:[%s1398_s6] ss:$0 sm:$0xff] }
  0x5c   : > { %800 = vmatpush3.msra.mxu0 %v413_v15  ;;  %830 = vmatprep.subr.mxu1 %v1119_v2 }
  0x5d   : > { %801 = vmatprep.subr.mxu0 %v1119_v2  ;;  %831 = vmatpush3.msra.mxu1 %v514_v38 }
  0x5e   : > { %802 = vmatpush3.msra.mxu0 %v412_v16  ;;  %832 = vmatprep.subr.mxu1 %v1119_v2 }
  0x5f   : > { %803 = vmatprep.subr.mxu0 %v1119_v2  ;;  %833 = vmatpush3.msra.mxu1 %v513_v39 }
  0x60   : > { %804 = vmatpush3.msra.mxu0 %v411_v17  ;;  %834 = vmatprep.subr.mxu1 %v1119_v2 }
  0x61   : > { %805 = vmatprep.subr.mxu0 %v1119_v2  ;;  %835 = vmatpush3.msra.mxu1 %v512_v40 }
  0x62   : > { %806 = vmatpush3.msra.mxu0 %v410_v18  ;;  %836 = vmatprep.subr.mxu1 %v1119_v2 }
  0x63   : > { %807 = vmatprep.subr.mxu0 %v1119_v2  ;;  %837 = vmatpush3.msra.mxu1 %v511_v41 }
  0x64   : > { %808 = vmatpush3.msra.mxu0 %v409_v19  ;;  %838 = vmatprep.subr.mxu1 %v1119_v2 }
  0x65   : > { %809 = vmatprep.subr.mxu0 %v1119_v2  ;;  %839 = vmatpush3.msra.mxu1 %v510_v42 }
  0x66   : > { %810 = vmatpush3.msra.mxu0 %v408_v20  ;;  %840 = vmatprep.subr.mxu1 %v1119_v2 }
  0x67   : > { %811 = vmatprep.subr.mxu0 %v1119_v2  ;;  %841 = vmatpush3.msra.mxu1 %v509_v43 }
  0x68   : > { %812 = vmatpush3.msra.mxu0 %v407_v21  ;;  %842 = vmatprep.subr.mxu1 %v1119_v2 }
  0x69   : > { %813 = vmatprep.subr.mxu0 %v1119_v2  ;;  %843 = vmatpush3.msra.mxu1 %v508_v44 }
  0x6a   : > { %814 = vmatpush3.msra.mxu0 %v406_v22  ;;  %844 = vmatprep.subr.mxu1 %v1119_v2 }
  0x6b   : > { %815 = vmatprep.subr.mxu0 %v1119_v2  ;;  %845 = vmatpush3.msra.mxu1 %v507_v45 }
  0x6c   : > { %816 = vmatpush3.msra.mxu0 %v405_v23  ;;  %846 = vmatprep.subr.mxu1 %v1119_v2 }
  0x6d   : > { %817 = vmatprep.subr.mxu0 %v1119_v2  ;;  %847 = vmatpush3.msra.mxu1 %v506_v46 }
  0x6e   : > { %818 = vmatpush3.msra.mxu0 %v404_v24  ;;  %848 = vmatprep.subr.mxu1 %v1119_v2 }
  0x6f   : > { %849 = vmatpush3.msra.mxu1 %v505_v47 }
  0x70   : > { %850 = vmatprep.subr.mxu1 %v1119_v2 }
  0x71   : > { %851 = vmatpush3.msra.mxu1 %v504_v48 }
  0x72   : > { %852 = vmatprep.subr.mxu1 %v1119_v2 }
  0x73   : > { %853 = vmatpush3.msra.mxu1 %v503_v49 }
  0xd8   : > { %v371_v8 = vpop.xlane.xlu0 %370 }
  0xd9   : > { %v372_v9 = vmul.f32 0.03125, %v371_v8 }
  0xdb   : > { %v373_v10 = vsub.f32 %v369_v0, %v372_v9 }
  0xdd   : > { %v377_v11 = vsel %vm376_vm0, %v373_v10, 0.0 }
  0xde   : > { %v378_v12 = vmul.f32 %v377_v11, %v377_v11 }
  0xe0   : > { %379 = vadd.xlane.f32.xlu0 %v378_v12 }
 0x169   : > { %v380_v29 = vpop.xlane.xlu0 %379 }
 0x16a   : > { %v381_v30 = vmul.f32 0.03125, %v380_v29 }
 0x16c   : > { %v382_v31 = vadd.f32 1e-05, %v381_v30 }
 0x16e   : > { %944 = vrsqrt.f32 %v382_v31 }
 0x17b   : > { %v945_v33 = vpop.eup %944 }
 0x17c   : > { %v391_v34 = vmul.f32 %v945_v33, %v745_v32 }
 0x17e   : > { %v392_v36 = vmul.f32 %v391_v34, %v377_v11 }
 0x180   : > { %v400_v37 = vadd.f32 %v746_v35, %v392_v36 }
 0x182   : > { %820 = vmatmul.mubr.f32.vlgmr.msra.gmra.mxu0 %v400_v37 }
 0x242   : > { %v493_v51 = vpop.f32.mrf.mxu0 }
 0x243   : > { %v494_v52 = vadd.f32 %v747_v50, %v493_v51 }
 0x244   : > { %v821_v53 = vpop.f32.mrf.mxu0 }
 0x245   : > { %v498_v54 = vmul.f32 0.70710677, %v494_v52  ;;  %v497_v56 = vmul.f32 0.5, %v494_v52 }
 0x247   : > { %946 = verf.f32 %v498_v54 }
 0x254   : > { %v947_v55 = vpop.eup %946 }
 0x255   : > { %v500_v57 = vadd.f32 1.0, %v947_v55 }
 0x257   : > { %v501_v58 = vmul.f32 %v500_v57, %v497_v56 }
 0x259   : > { %855 = vmatmul.mubr.f32.vlgmr.msra.gmra.mxu1 %v501_v58 }
 0x319   : > { %v585_v60 = vpop.f32.mrf.mxu1 }
 0x31a   : > { %v602_v61 = vadd.f32 %v748_v59, %v585_v60 }
 0x31b   : > { %v856_v62 = vpop.f32.mrf.mxu1 }
 0x31c   : > { %603 = vst [vmem:[%s360_s19] sm:$0xff] %v602_v61 }
 0x31d   : > { %1041 = shalt.err (!%p1038_p5)
}
 0x31e   : > { %s1042_s11 = scalar_lea.hbm %s1350_s15, 128  ;;  %s1046_s30 = scalar_lea.hbm %s1399_s7, 256 }
 0x31f   : > { %p1043_p10 = scmp.ne.s32.totalorder %s1350_s15, %s1042_s11  ;;  %p1047_p6 = scmp.lt.s32.totalorder %s1350_s15, %s1399_s7 }
 0x320   : > { %p1048_p12 = scmp.lt.s32.totalorder %s1046_s30, %s1042_s11 }
 0x321   : > { %p1044_p1 = pnand %p1043_p10, %p1257_p7 }
 0x322   : > { %p1049_p3 = por %p1048_p12, %p1047_p6 }
 0x323   : > { %p1045_p4 = pneg %p1044_p1 }
 0x325   : > { %p1050_p8 = pnand %p1049_p3, %p1045_p4 }
 0x327   : > { %1053 = shalt.err (!%p1050_p8)
}
 0x328   : > { %867 = dma.vmem_to_hbm [thread:$0]  (%p1257_p7), %s619_s17, 128, %s1350_s15, %s605_s3  }
 0x329 PF: > { %s630_s10 = sand.u32 1, %s1092_s24   ;;  %p1419_p9 = scmp.ne.s32.totalorder %s1409_s12, 0 }
 0x32a   : > { %p1420_p11 = scmp.ge.s32.totalorder %s1112_s29, 2  ;;  %s631_s19 = scalar_lea.sflag [#allocation6], %s630_s10 }
 0x32c   : > { %p881_p2 = pnand %p1420_p11, %p1419_p9 }
 0x32e   : > { %p882_p13 = pneg %p881_p2 }
 0x330   : > { %1087 = dma.done.wait (%p882_p13), %s631_s19, 128  }
 0x331   : > { %1089 = vsyncadd (%p882_p13), %s631_s19, 4294967168  ;;  %s24_s29 = sadd.s32 1, %s1112_s29   ;;  %s1421_s16 = sld [smem:[#allocation14_spill]] }
 0x332   : > { %p21_p0 = scmp.ge.s32.totalorder %s24_s29, 4   ;;  %s1422_s24 = smov %s1096_s25 }
 0x333   : > { %s1423_s25 = smov %s1100_s26  ;;  %s1424_s26 = smov %s1266_s21 }
 0x334   : > { %s1425_s27 = smov %s1108_s28  ;;  %23 = sbr.rel (!%p21_p0) target bundleno = 10 (0xa), region = 114 }
 0x337   : > { %s1426_s28 = smov %s1421_s16 }
 0x339   :  { %636 = vsyncpa [#allocation5], 1 }
 0x33a   :  { %638 = vsyncpa [#allocation5 + $0x1], 1 }
 0x33b   :  { %639 = vsyncpa [#allocation8], 1 }
 0x33c   :  { %640 = vsyncpa [#allocation6], 1 }
 0x33d   :  { %642 = vsyncpa [#allocation6 + $0x1], 1 }

</bundles_post_ra>
